<compile_context>
chip_gen: v7x
topology: tpu7x:2x2x1
jax: 0.10.0
libtpu: 0.0.40
codegen_flags: <defaults>
</compile_context>

<pallas_src>
import functools

import jax
import jax.numpy as jnp
from jax.experimental import pallas as pl
from jax.experimental.pallas import tpu as pltpu


def _round_up(x, m):
    return ((x + m - 1) // m) * m


def _pick_tile(dim_padded, unit, cap):
    """Largest multiple of `unit` that divides dim_padded and is <= cap."""
    best = unit
    t = unit
    limit = min(cap, dim_padded)
    while t <= limit:
        if dim_padded % t == 0:
            best = t
        t += unit
    return best


def _complex_linear_kernel(xr_ref, xi_ref, wr_ref, wi_ref, or_ref, oi_ref):
    """One K-step: 4 bf16 MXU dots, f32 accumulation directly in the outputs."""

    @pl.when(pl.program_id(2) == 0)
    def _():
        or_ref[...] = jnp.zeros_like(or_ref)
        oi_ref[...] = jnp.zeros_like(oi_ref)

    xr = xr_ref[...]
    xi = xi_ref[...]
    wr = wr_ref[...]  # (tk, tn) tile of wr^T
    wi = wi_ref[...]  # (tk, tn) tile of wi^T

    or_ref[...] += (
        jnp.dot(xr, wr, preferred_element_type=jnp.float32)
        - jnp.dot(xi, wi, preferred_element_type=jnp.float32)
    )
    oi_ref[...] += (
        jnp.dot(xi, wr, preferred_element_type=jnp.float32)
        + jnp.dot(xr, wi, preferred_element_type=jnp.float32)
    )


def pack_complex_linear_weights(w_r, w_i):
    """One-time packing: torch-layout (Out, In) f32 -> padded (K_pad, N_pad) bf16.

    Call this once at module init; do NOT re-run it per forward call.
    """
    out_features, in_features = w_r.shape
    k_pad = _round_up(in_features, 128)
    n_pad = _round_up(out_features, 128)

    def pack(w):
        wt = jnp.asarray(w, jnp.float32).T  # (In, Out)
        wt = jnp.pad(wt, ((0, k_pad - in_features), (0, n_pad - out_features)))
        return wt.astype(jnp.bfloat16)

    return pack(w_r), pack(w_i)


@functools.partial(jax.jit, static_argnames=("out_features",))
def complex_linear(x_complex, wr_t_p, wi_t_p, *, out_features):
    """x_complex: (B, In) complex64. wr_t_p / wi_t_p: packed bf16 (K_pad, N_pad)."""
    xr = jnp.real(x_complex).astype(jnp.bfloat16)
    xi = jnp.imag(x_complex).astype(jnp.bfloat16)
    B, in_features = xr.shape
    k_pad, n_pad = wr_t_p.shape
    m_pad = _round_up(B, 16)  # bf16 sublane tile is 16

    if (m_pad != B) or (k_pad != in_features):
        pad = ((0, m_pad - B), (0, k_pad - in_features))
        xr = jnp.pad(xr, pad)
        xi = jnp.pad(xi, pad)

    # Tile sizes: divisors of the padded extents, capped so double-buffered
    # tiles stay well inside v5e 16 MiB / v6e 32 MiB / v7x 32 MiB scoped VMEM.
    tm = _pick_tile(m_pad, 16, 512)
    tk = _pick_tile(k_pad, 128, 512)
    tn = _pick_tile(n_pad, 128, 512)

    # v7x: make sure at least one parallel axis has >= 2 tiles so both
    # TensorCores get work (only possible if N has >= 2 lane groups).
    if (m_pad // tm == 1) and (n_pad // tn == 1) and (n_pad % 256 == 0):
        tn = n_pad // 2

    grid = (m_pad // tm, n_pad // tn, k_pad // tk)

    out_r, out_i = pl.pallas_call(
        _complex_linear_kernel,
        out_shape=(
            jax.ShapeDtypeStruct((m_pad, n_pad), jnp.float32),
            jax.ShapeDtypeStruct((m_pad, n_pad), jnp.float32),
        ),
        grid=grid,
        in_specs=[
            pl.BlockSpec((tm, tk), lambda i, j, k: (i, k)),  # xr
            pl.BlockSpec((tm, tk), lambda i, j, k: (i, k)),  # xi
            pl.BlockSpec((tk, tn), lambda i, j, k: (k, j)),  # wr^T
            pl.BlockSpec((tk, tn), lambda i, j, k: (k, j)),  # wi^T
        ],
        out_specs=(
            pl.BlockSpec((tm, tn), lambda i, j, k: (i, j)),  # real
            pl.BlockSpec((tm, tn), lambda i, j, k: (i, j)),  # imag
        ),
        compiler_params=pltpu.CompilerParams(
            dimension_semantics=("parallel", "parallel", "arbitrary"),
            vmem_limit_bytes=64 << 20,
        ),
    )(xr, xi, wr_t_p, wi_t_p)

    real = out_r[:B, :out_features]
    imag = out_i[:B, :out_features]
    return jax.lax.complex(real, imag).astype(jnp.complex64)


def _reference(x_complex, w_r, w_i):
    xr = jnp.real(x_complex).astype(jnp.float32)
    xi = jnp.imag(x_complex).astype(jnp.float32)
    real = xr @ w_r.T - xi @ w_i.T
    imag = xi @ w_r.T + xr @ w_i.T
    return (real + 1j * imag).astype(jnp.complex64)


if __name__ == "__main__":
    key = jax.random.PRNGKey(0)
    k1, k2, k3, k4 = jax.random.split(key, 4)

    batch = 8
    in_features = 32
    out_features = 32

    # Deterministic synthetic parameters (torch nn.Linear init range).
    bound = 1.0 / (in_features ** 0.5)
    w_r = jax.random.uniform(
        k1, (out_features, in_features), jnp.float32, -bound, bound
    )
    w_i = jax.random.uniform(
        k2, (out_features, in_features), jnp.float32, -bound, bound
    )

    x_real = jax.random.normal(k3, (batch, in_features), jnp.float32)
    x_imag = jax.random.normal(k4, (batch, in_features), jnp.float32)
    x = (x_real + 1j * x_imag).astype(jnp.complex64)

    # One-time weight packing (hoisted out of the per-call path).
    wr_t_p, wi_t_p = pack_complex_linear_weights(w_r, w_i)
    wr_t_p, wi_t_p = jax.block_until_ready((wr_t_p, wi_t_p))

    out = complex_linear(x, wr_t_p, wi_t_p, out_features=out_features)
    out = jax.block_until_ready(out)

    ref = _reference(x, w_r, w_i)
    assert out.shape == (batch, out_features)
    assert out.dtype == jnp.complex64
    # bf16 MXU inputs with f32 accumulation -> loosened tolerance vs f32 ref.
    assert jnp.allclose(out, ref, atol=3e-2, rtol=3e-2)

    print("KERNEL_OK")
</pallas_src>

<mosaic_0001>
module attributes {stable_mosaic.version = 11 : i64} {
  func.func @_complex_linear_kernel(%arg0: i32, %arg1: i32, %arg2: i32, %arg3: memref<16x128xbf16, #tpu.memory_space<vmem>>, %arg4: memref<16x128xbf16, #tpu.memory_space<vmem>>, %arg5: memref<128x128xbf16, #tpu.memory_space<vmem>>, %arg6: memref<128x128xbf16, #tpu.memory_space<vmem>>, %arg7: memref<16x128xf32, #tpu.memory_space<vmem>>, %arg8: memref<16x128xf32, #tpu.memory_space<vmem>>) attributes {dimension_semantics = [#tpu.dimension_semantics<parallel>, #tpu.dimension_semantics<parallel>, #tpu.dimension_semantics<arbitrary>], iteration_bounds = array<i64: 1, 1, 1>, scalar_prefetch = 0 : i64, scratch_operands = 0 : i64, tpu.core_type = #tpu.core_type<tc>, window_params = [{transform_indices = @transform_0, window_bounds = array<i64: 16, 128>}, {transform_indices = @transform_1, window_bounds = array<i64: 16, 128>}, {transform_indices = @transform_2, window_bounds = array<i64: 128, 128>}, {transform_indices = @transform_3, window_bounds = array<i64: 128, 128>}, {transform_indices = @transform_4, window_bounds = array<i64: 16, 128>}, {transform_indices = @transform_5, window_bounds = array<i64: 16, 128>}]} {
    %c0_i32 = arith.constant 0 : i32
    %0 = arith.cmpi eq, %arg2, %c0_i32 : i32
    %1 = arith.extui %0 : i1 to i32
    %c0_i32_0 = arith.constant 0 : i32
    %2 = arith.cmpi ne, %1, %c0_i32_0 : i32
    scf.if %2 {
      %cst_19 = arith.constant 0.000000e+00 : f32
      %19 = vector.broadcast %cst_19 : f32 to vector<16x128xf32>
      %c0_20 = arith.constant 0 : index
      %c0_21 = arith.constant 0 : index
      %20 = vector.load %arg7[%c0_20, %c0_21] : memref<16x128xf32, #tpu.memory_space<vmem>>, vector<16x128xf32>
      tpu.vector_store %arg7[%c0_20, %c0_21], %19 {strides = array<i32>} : memref<16x128xf32, #tpu.memory_space<vmem>>, vector<16x128xf32>,
      %cst_22 = arith.constant 0.000000e+00 : f32
      %21 = vector.broadcast %cst_22 : f32 to vector<16x128xf32>
      %c0_23 = arith.constant 0 : index
      %c0_24 = arith.constant 0 : index
      %22 = vector.load %arg8[%c0_23, %c0_24] : memref<16x128xf32, #tpu.memory_space<vmem>>, vector<16x128xf32>
      tpu.vector_store %arg8[%c0_23, %c0_24], %21 {strides = array<i32>} : memref<16x128xf32, #tpu.memory_space<vmem>>, vector<16x128xf32>,
    } else {
    }
    %c0 = arith.constant 0 : index
    %c0_1 = arith.constant 0 : index
    %3 = vector.load %arg3[%c0, %c0_1] : memref<16x128xbf16, #tpu.memory_space<vmem>>, vector<16x128xbf16>
    %c0_2 = arith.constant 0 : index
    %c0_3 = arith.constant 0 : index
    %4 = vector.load %arg4[%c0_2, %c0_3] : memref<16x128xbf16, #tpu.memory_space<vmem>>, vector<16x128xbf16>
    %c0_4 = arith.constant 0 : index
    %c0_5 = arith.constant 0 : index
    %5 = vector.load %arg5[%c0_4, %c0_5] : memref<128x128xbf16, #tpu.memory_space<vmem>>, vector<128x128xbf16>
    %c0_6 = arith.constant 0 : index
    %c0_7 = arith.constant 0 : index
    %6 = vector.load %arg6[%c0_6, %c0_7] : memref<128x128xbf16, #tpu.memory_space<vmem>>, vector<128x128xbf16>
    %c0_8 = arith.constant 0 : index
    %c0_9 = arith.constant 0 : index
    %7 = vector.load %arg7[%c0_8, %c0_9] : memref<16x128xf32, #tpu.memory_space<vmem>>, vector<16x128xf32>
    %cst = arith.constant dense<0.000000e+00> : vector<16x128xf32>
    %8 = tpu.matmul %3, %5, %cst {dimension_numbers = #tpu.dot_dimension_numbers<[1], [0], [0], [1], [0, 0, 1, 1], [], []>} : vector<16x128xbf16>, vector<128x128xbf16>, vector<16x128xf32> -> vector<16x128xf32>
    %cst_10 = arith.constant dense<0.000000e+00> : vector<16x128xf32>
    %9 = tpu.matmul %4, %6, %cst_10 {dimension_numbers = #tpu.dot_dimension_numbers<[1], [0], [0], [1], [0, 0, 1, 1], [], []>} : vector<16x128xbf16>, vector<128x128xbf16>, vector<16x128xf32> -> vector<16x128xf32>
    %10 = arith.subf %8, %9 : vector<16x128xf32>
    %11 = arith.addf %7, %10 : vector<16x128xf32>
    %c0_11 = arith.constant 0 : index
    %c0_12 = arith.constant 0 : index
    %12 = vector.load %arg7[%c0_11, %c0_12] : memref<16x128xf32, #tpu.memory_space<vmem>>, vector<16x128xf32>
    tpu.vector_store %arg7[%c0_11, %c0_12], %11 {strides = array<i32>} : memref<16x128xf32, #tpu.memory_space<vmem>>, vector<16x128xf32>,
    %c0_13 = arith.constant 0 : index
    %c0_14 = arith.constant 0 : index
    %13 = vector.load %arg8[%c0_13, %c0_14] : memref<16x128xf32, #tpu.memory_space<vmem>>, vector<16x128xf32>
    %cst_15 = arith.constant dense<0.000000e+00> : vector<16x128xf32>
    %14 = tpu.matmul %4, %5, %cst_15 {dimension_numbers = #tpu.dot_dimension_numbers<[1], [0], [0], [1], [0, 0, 1, 1], [], []>} : vector<16x128xbf16>, vector<128x128xbf16>, vector<16x128xf32> -> vector<16x128xf32>
    %cst_16 = arith.constant dense<0.000000e+00> : vector<16x128xf32>
    %15 = tpu.matmul %3, %6, %cst_16 {dimension_numbers = #tpu.dot_dimension_numbers<[1], [0], [0], [1], [0, 0, 1, 1], [], []>} : vector<16x128xbf16>, vector<128x128xbf16>, vector<16x128xf32> -> vector<16x128xf32>
    %16 = arith.addf %14, %15 : vector<16x128xf32>
    %17 = arith.addf %13, %16 : vector<16x128xf32>
    %c0_17 = arith.constant 0 : index
    %c0_18 = arith.constant 0 : index
    %18 = vector.load %arg8[%c0_17, %c0_18] : memref<16x128xf32, #tpu.memory_space<vmem>>, vector<16x128xf32>
    tpu.vector_store %arg8[%c0_17, %c0_18], %17 {strides = array<i32>} : memref<16x128xf32, #tpu.memory_space<vmem>>, vector<16x128xf32>,
    return
  }
  func.func @transform_0(%arg0: i32, %arg1: i32, %arg2: i32) -> (i32, i32) {
    %c0_i32 = arith.constant 0 : i32
    return %arg0, %arg2 : i32, i32
  }
  func.func @transform_1(%arg0: i32, %arg1: i32, %arg2: i32) -> (i32, i32) {
    %c0_i32 = arith.constant 0 : i32
    return %arg0, %arg2 : i32, i32
  }
  func.func @transform_2(%arg0: i32, %arg1: i32, %arg2: i32) -> (i32, i32) {
    %c0_i32 = arith.constant 0 : i32
    return %arg2, %arg1 : i32, i32
  }
  func.func @transform_3(%arg0: i32, %arg1: i32, %arg2: i32) -> (i32, i32) {
    %c0_i32 = arith.constant 0 : i32
    return %arg2, %arg1 : i32, i32
  }
  func.func @transform_4(%arg0: i32, %arg1: i32, %arg2: i32) -> (i32, i32) {
    %c0_i32 = arith.constant 0 : i32
    return %arg0, %arg1 : i32, i32
  }
  func.func @transform_5(%arg0: i32, %arg1: i32, %arg2: i32) -> (i32, i32) {
    %c0_i32 = arith.constant 0 : i32
    return %arg0, %arg1 : i32, i32
  }
}

</mosaic_0001>

<bundles_post_ra>
// kernel: custom-call.1
= control target key start
LH: loop header
LB: loop body
LE: loop exit
PB: predicated region body
PF: predicated region fallthrough
CT: control target
= control target key end

     0   :  { %s59_s0 = inlined_call_operand.hbm [shape: c64[8,32], index: 0, kind: input, shape index: {}]   ;;  %s60_s1 = inlined_call_operand.vmem [shape: f32[8,32], index: 1, kind: output, shape index: {}]  }
   0x1   :  { %s2_s8 = scalar_lea.hbm %s59_s0, 128 }
   0x2   :  { %3 = vsyncpa [#allocation0], 0  ;;  %s4_s11 = sshll.u32 %s60_s1, 4  ;;  %s34_s14 = scalar_lea.hbm %s59_s0, 256  ;;  %s5_s11 = int_to_ptr.vmem [resolvable:$true] %s4_s11 }
   0x3   :  { %p11_p0 = scmp.ne.s32.totalorder %s2_s8, %s34_s14  ;;  %p13_p1 = scmp.lt.u32.totalorder %s2_s8, %s59_s0 }
   0x4   :  { %p14_p2 = scmp.lt.u32.totalorder %s34_s14, %s34_s14  ;;  %p16_p4 = scmp.lt.u32.totalorder %s34_s14, %s2_s8 }
   0x6   :  { %p15_p3 = por %p14_p2, %p13_p1 }
   0x8   :  { %p17_p5 = por %p16_p4, %p15_p3 }
   0xa   :  { %p18_p6 = pnand %p17_p5, %p11_p0 }
   0xc   :  { %21 = shalt.err (!%p18_p6)  }
   0xd   :  { %s22_s17 = scalar_lea.vmem %s5_s11, 128  ;;  %p27_p8 = scmp.lt.s32.totalorder %s5_s11, %s5_s11 }
   0xe   :  { %p23_p7 = scmp.ne.s32.totalorder %s5_s11, %s22_s17  ;;  %p28_p9 = scmp.lt.s32.totalorder %s22_s17, %s22_s17 }
  0x10   :  { %p29_p10 = por %p28_p9, %p27_p8 }
  0x12   :  { %p30_p11 = pnand %p29_p10, %p23_p7 }
  0x14   :  { %33 = shalt.err (!%p30_p11)  }
  0x15   :  { %7 = dma.hbm_to_vmem [thread:$0]  %s2_s8, 128, %s5_s11, [#allocation0] }
  0x16   :  { %35 = dma.done.wait [#allocation0], 128  }
  0x17   :  { %36 = vsyncadd [#allocation0], 4294967168 }
  0x18   :  { %9 = vsyncpa [#allocation0], 1 }

// kernel: custom-call
= control target key start
LH: loop header
LB: loop body
LE: loop exit
PB: predicated region body
PF: predicated region fallthrough
CT: control target
= control target key end

     0   :  { %2 = vsyncpa [#allocation0], 0  ;;  %s61_s0 = inlined_call_operand.hbm [shape: c64[8,32], index: 0, kind: input, shape index: {}]   ;;  %s62_s1 = inlined_call_operand.vmem [shape: f32[8,32], index: 1, kind: output, shape index: {}]  }
   0x1   :  { %s3_s8 = sshll.u32 %s62_s1, 4  ;;  %s9_s11 = scalar_lea.hbm %s61_s0, 128  ;;  %s4_s8 = int_to_ptr.vmem [resolvable:$true] %s3_s8 }
   0x2   :  { %p10_p0 = scmp.ne.s32.totalorder %s61_s0, %s9_s11  ;;  %s11_s16 = scalar_lea.hbm %s61_s0, 256 }
   0x3   :  { %p12_p1 = scmp.lt.u32.totalorder %s11_s16, %s9_s11  ;;  %p13_p2 = scmp.lt.u32.totalorder %s9_s11, %s61_s0 }
   0x5   :  { %p14_p3 = por %p13_p2, %p12_p1 }
   0x7   :  { %p15_p4 = pnand %p14_p3, %p10_p0 }
   0x9   :  { %18 = shalt.err (!%p15_p4)  }
   0xa   :  { %s19_s1 = scalar_lea.vmem %s4_s8, 128  ;;  %p24_p6 = scmp.lt.s32.totalorder %s4_s8, %s4_s8 }
   0xb   :  { %p20_p5 = scmp.ne.s32.totalorder %s4_s8, %s19_s1  ;;  %p25_p7 = scmp.lt.s32.totalorder %s19_s1, %s19_s1 }
   0xd   :  { %p26_p8 = por %p25_p7, %p24_p6 }
   0xf   :  { %p27_p9 = pnand %p26_p8, %p20_p5 }
  0x11   :  { %30 = shalt.err (!%p27_p9)  }
  0x12   :  { %6 = dma.hbm_to_vmem [thread:$0]  %s61_s0, 128, %s4_s8, [#allocation0] }
  0x13   :  { %31 = dma.done.wait [#allocation0], 128  }
  0x14   :  { %32 = vsyncadd [#allocation0], 4294967168 }
  0x15   :  { %8 = vsyncpa [#allocation0], 1 }

// kernel: custom-call.2
= control target key start
LH: loop header
LB: loop body
LE: loop exit
PB: predicated region body
PF: predicated region fallthrough
CT: control target
= control target key end

     0   :  { %s126_s0 = inlined_call_operand.vmem [shape: f32[8,32], index: 0, kind: input, shape index: {}]   ;;  %s127_s1 = inlined_call_operand.vmem [shape: f32[8,32], index: 1, kind: input, shape index: {}]   ;;  %s128_s2 = inlined_call_operand.hbm [shape: c64[8,32], index: 2, kind: output, shape index: {}]  }
   0x1   :  { %s87_s11 = scalar_lea.hbm %s128_s2, 128 }
   0x2   :  { %4 = vsyncpa [#allocation0], 0  ;;  %s5_s14 = sshll.u32 %s126_s0, 4  ;;  %s6_s14 = int_to_ptr.vmem [resolvable:$true] %s5_s14 }
   0x3   :  { %s18_s15 = scalar_lea.vmem %s6_s14, 128  ;;  %p23_p1 = scmp.lt.s32.totalorder %s6_s14, %s6_s14 }
   0x4   :  { %p19_p0 = scmp.ne.s32.totalorder %s6_s14, %s18_s15  ;;  %p24_p2 = scmp.lt.s32.totalorder %s18_s15, %s18_s15 }
   0x6   :  { %p25_p3 = por %p24_p2, %p23_p1 }
   0x8   :  { %p26_p4 = pnand %p25_p3, %p19_p0 }
   0xa   :  { %29 = shalt.err (!%p26_p4)  }
   0xb   :  { %p31_p5 = scmp.ne.s32.totalorder %s128_s2, %s87_s11  ;;  %s32_s0 = scalar_lea.hbm %s128_s2, 256 }
   0xc   :  { %p33_p6 = scmp.lt.u32.totalorder %s32_s0, %s87_s11  ;;  %p34_p7 = scmp.lt.u32.totalorder %s87_s11, %s128_s2 }
   0xe   :  { %p35_p8 = por %p34_p7, %p33_p6 }
  0x10   :  { %p36_p9 = pnand %p35_p8, %p31_p5 }
  0x12   :  { %39 = shalt.err (!%p36_p9)  }
  0x13   :  { %8 = dma.vmem_to_hbm [thread:$0]  %s6_s14, 128, %s128_s2, [#allocation0] }
  0x14   :  { %65 = dma.done.wait [#allocation0], 128  }
  0x15   :  { %66 = vsyncadd [#allocation0], 4294967168 }
  0x16   :  { %10 = vsyncpa [#allocation0], 1 }
  0x17   :  { %11 = vsyncpa [#allocation1], 0  ;;  %s12_s28 = sshll.u32 %s127_s1, 4  ;;  %s13_s28 = int_to_ptr.vmem [resolvable:$true] %s12_s28 }
  0x18   :  { %s40_s29 = scalar_lea.vmem %s13_s28, 128  ;;  %p45_p11 = scmp.lt.s32.totalorder %s13_s28, %s13_s28 }
  0x19   :  { %p41_p10 = scmp.ne.s32.totalorder %s13_s28, %s40_s29  ;;  %p46_p12 = scmp.lt.s32.totalorder %s40_s29, %s40_s29 }
  0x1b   :  { %p47_p13 = por %p46_p12, %p45_p11 }
  0x1d   :  { %p48_p0 = pnand %p47_p13, %p41_p10 }
  0x1f   :  { %51 = shalt.err (!%p48_p0)  }
  0x20   :  { %p53_p1 = scmp.ne.s32.totalorder %s87_s11, %s32_s0  ;;  %p56_p2 = scmp.lt.u32.totalorder %s32_s0, %s32_s0 }
  0x22   :  { %p57_p3 = por %p56_p2, %p34_p7 }
  0x24   :  { %p59_p4 = por %p57_p3, %p33_p6 }
  0x26   :  { %p60_p5 = pnand %p59_p4, %p53_p1 }
  0x28   :  { %63 = shalt.err (!%p60_p5)  }
  0x29   :  { %15 = dma.vmem_to_hbm [thread:$0]  %s13_s28, 128, %s87_s11, [#allocation1] }
  0x2a   :  { %67 = dma.done.wait [#allocation1], 128  }
  0x2b   :  { %68 = vsyncadd [#allocation1], 4294967168 }
  0x2c   :  { %17 = vsyncpa [#allocation1], 1 }

// kernel: complex_linear.1
= control target key start
LH: loop header
LB: loop body
LE: loop exit
PB: predicated region body
PF: predicated region fallthrough
CT: control target
= control target key end

     0   :  { %11 = vsyncpa [#allocation3], 0  ;;  %s934_s0 = inlined_call_operand.hbm [shape: bf16[16,128], index: 0, kind: input, shape index: {}]   ;;  %s935_s1 = inlined_call_operand.hbm [shape: bf16[16,128], index: 1, kind: input, shape index: {}]   ;;  %s936_s2 = inlined_call_operand.hbm [shape: bf16[128,128], index: 2, kind: input, shape index: {}]   ;;  %s937_s3 = inlined_call_operand.hbm [shape: bf16[128,128], index: 3, kind: input, shape index: {}]   ;;  %s938_s4 = inlined_call_operand.hbm [shape: f32[16,128], index: 4, kind: output, shape index: {0}]   ;;  %s939_s5 = inlined_call_operand.hbm [shape: f32[16,128], index: 5, kind: output, shape index: {1}]  }
   0x1   :  { %12 = vsyncpa [#allocation6], 0 }
   0x2   :  { %13 = vsyncpa [#allocation9], 0 }
   0x3   :  { %14 = vsyncpa [#allocation4], 0 }
   0x4   :  { %15 = vsyncpa [#allocation12], 0  ;;  %s748_s18 = smov [#allocation5]   ;;  %s749_s20 = smov [#allocation2]  }
   0x5   :  { %s33_s19 = sshll.u32 %s748_s18, 4  ;;  %s21_s21 = sshll.u32 %s749_s20, 4  ;;  %s34_s19 = int_to_ptr.vmem [resolvable:$true] %s33_s19  ;;  %s790_s21 = int_to_ptr.vmem [resolvable:$true] %s21_s21 }
   0x6   :  { %s606_s24 = scalar_lea.hbm %s935_s1, 128 }
   0x7   :  { %p607_p0 = scmp.ne.s32.totalorder %s935_s1, %s606_s24  ;;  %p610_p1 = scmp.lt.u32.totalorder %s606_s24, %s935_s1 }
   0x9   :  { %p612_p2 = pnand %p610_p1, %p607_p0 }
   0xb   :  { %615 = shalt.err (!%p612_p2)
}
   0xc   :  { %s616_s29 = scalar_lea.vmem %s34_s19, 128  ;;  %p621_p4 = scmp.lt.s32.totalorder %s34_s19, %s34_s19 }
   0xd   :  { %p617_p3 = scmp.ne.s32.totalorder %s34_s19, %s616_s29  ;;  %p622_p5 = scmp.lt.s32.totalorder %s616_s29, %s616_s29 }
   0xf   :  { %p623_p6 = por %p622_p5, %p621_p4 }
  0x11   :  { %p624_p7 = pnand %p623_p6, %p617_p3 }
  0x13   :  { %627 = shalt.err (!%p624_p7)
}
  0x14   :  { %s750_s30 = smov 64   ;;  %s751_s6 = smov 4  }
  0x15   :  { %39 = dma.hbm_to_vmem [thread:$0]  %s935_s1, 128, %s34_s19, [#allocation6], %s750_s30, %s750_s30, %s751_s6  }
  0x16   :  { %s628_s11 = scalar_lea.hbm %s934_s0, 128 }
  0x17   :  { %p629_p8 = scmp.ne.s32.totalorder %s934_s0, %s628_s11  ;;  %p632_p9 = scmp.lt.u32.totalorder %s628_s11, %s934_s0 }
  0x19   :  { %p634_p10 = pnand %p632_p9, %p629_p8 }
  0x1b   :  { %637 = shalt.err (!%p634_p10)
}
  0x1c   :  { %s638_s16 = scalar_lea.vmem %s790_s21, 128  ;;  %p643_p12 = scmp.lt.s32.totalorder %s790_s21, %s790_s21 }
  0x1d   :  { %p639_p11 = scmp.ne.s32.totalorder %s790_s21, %s638_s16  ;;  %p644_p13 = scmp.lt.s32.totalorder %s638_s16, %s638_s16 }
  0x1f   :  { %p645_p0 = por %p644_p13, %p643_p12 }
  0x21   :  { %p646_p1 = pnand %p645_p0, %p639_p11 }
  0x23   :  { %649 = shalt.err (!%p646_p1)
}
  0x24   :  { %27 = dma.hbm_to_vmem [thread:$0]  %s934_s0, 128, %s790_s21, [#allocation3], %s750_s30, %s750_s30, %s751_s6  }
  0x25   :  { %s752_s18 = smov [#allocation7]   ;;  %s753_s20 = smov [#allocation8]  }
  0x26   :  { %s45_s19 = sshll.u32 %s752_s18, 4  ;;  %s57_s22 = sshll.u32 %s753_s20, 4  ;;  %s46_s19 = int_to_ptr.vmem [resolvable:$true] %s45_s19  ;;  %s827_s22 = int_to_ptr.vmem [resolvable:$true] %s57_s22 }
  0x27   :  { %s650_s25 = scalar_lea.hbm %s936_s2, 1024 }
  0x28   :  { %p651_p2 = scmp.ne.s32.totalorder %s936_s2, %s650_s25  ;;  %p654_p3 = scmp.lt.u32.totalorder %s650_s25, %s936_s2 }
  0x2a   :  { %p656_p4 = pnand %p654_p3, %p651_p2 }
  0x2c   :  { %659 = shalt.err (!%p656_p4)
}
  0x2d   :  { %s660_s0 = scalar_lea.vmem %s46_s19, 1024  ;;  %p665_p6 = scmp.lt.s32.totalorder %s46_s19, %s46_s19 }
  0x2e   :  { %p661_p5 = scmp.ne.s32.totalorder %s46_s19, %s660_s0  ;;  %p666_p7 = scmp.lt.s32.totalorder %s660_s0, %s660_s0 }
  0x30   :  { %p667_p8 = por %p666_p7, %p665_p6 }
  0x32   :  { %p668_p9 = pnand %p667_p8, %p661_p5 }
  0x34   :  { %671 = shalt.err (!%p668_p9)
}
  0x35   :  { %51 = dma.hbm_to_vmem [thread:$0]  %s936_s2, 1024, %s46_s19, [#allocation6], %s750_s30, %s750_s30, %s751_s6  }
  0x36   :  { %s672_s10 = scalar_lea.hbm %s937_s3, 1024 }
  0x37   :  { %p673_p10 = scmp.ne.s32.totalorder %s937_s3, %s672_s10  ;;  %p676_p11 = scmp.lt.u32.totalorder %s672_s10, %s937_s3 }
  0x39   :  { %p678_p12 = pnand %p676_p11, %p673_p10 }
  0x3b   :  { %681 = shalt.err (!%p678_p12)
}
  0x3c   :  { %s682_s15 = scalar_lea.vmem %s827_s22, 1024  ;;  %p687_p0 = scmp.lt.s32.totalorder %s827_s22, %s827_s22 }
  0x3d   :  { %p683_p13 = scmp.ne.s32.totalorder %s827_s22, %s682_s15  ;;  %p688_p1 = scmp.lt.s32.totalorder %s682_s15, %s682_s15 }
  0x3f   :  { %p689_p2 = por %p688_p1, %p687_p0 }
  0x41   :  { %p690_p3 = pnand %p689_p2, %p683_p13 }
  0x43   :  { %693 = shalt.err (!%p690_p3)
}
  0x44   :  { %63 = dma.hbm_to_vmem [thread:$0]  %s937_s3, 1024, %s827_s22, [#allocation9], %s750_s30, %s750_s30, %s751_s6  }
  0x45   :  { %738 = dma.done.wait [#allocation3], 128  }
  0x46   :  { %739 = vsyncadd [#allocation3], 4294967168 }
  0x47   :  { %740 = dma.done.wait [#allocation6], 1152  }
  0x48   :  { %741 = vsyncadd [#allocation6], 4294966144 }
  0x49   :  { %742 = dma.done.wait [#allocation9], 1024  }
  0x4a   :  { %743 = vsyncadd [#allocation9], 4294966272  ;;  %v754_v0 = vmov 0.0   ;;  %vm755_vm0 = vmmov 0   ;;  %v588_v1 = vld [vmem:[#allocation7] sm:$0xff]   ;;  %v590_v3 = vld [vmem:[#allocation7 + $0x8] sm:$0xff]  }
  0x4b   :  { %496 = vmatprep.subr.bf16.mxu0 %v754_v0  ;;  %516 = vmatprep.subr.bf16.mxu1 %v754_v0  ;;  %v589_v2 = vld [vmem:[#allocation8] sm:$0xff]   ;;  %v591_v4 = vld [vmem:[#allocation8 + $0x8] sm:$0xff]   ;;  %v592_v5 = vld [vmem:[#allocation7 + $0x10] sm:$0xff]   ;;  %s756_s3 = smov [#allocation10]  }
  0x4c   :  { %512 = vmatprep.mubr.msk.bf16.mxu0 %vm755_vm0, %v754_v0  ;;  %532 = vmatprep.mubr.msk.bf16.mxu1 %vm755_vm0, %v754_v0  ;;  %v593_v6 = vld [vmem:[#allocation8 + $0x10] sm:$0xff]   ;;  %v594_v7 = vld [vmem:[#allocation7 + $0x18] sm:$0xff]   ;;  %v596_v9 = vld [vmem:[#allocation7 + $0x20] sm:$0xff]   ;;  %s412_s30 = sshll.u32 %s756_s3, 4  ;;  %s413_s30 = int_to_ptr.vmem [resolvable:$true] %s412_s30 }
  0x4d   :  { %497 = vmatpush3.bf16.msra.mxu0 %v588_v1  ;;  %517 = vmatpush3.bf16.msra.mxu1 %v589_v2  ;;  %v595_v8 = vld [vmem:[#allocation8 + $0x18] sm:$0xff]   ;;  %v597_v10 = vld [vmem:[#allocation8 + $0x20] sm:$0xff]   ;;  %v598_v11 = vld [vmem:[#allocation7 + $0x28] sm:$0xff]   ;;  %s694_s6 = scalar_lea.vmem %s413_s30, 256  ;;  %p699_p5 = scmp.lt.s32.totalorder %s413_s30, %s413_s30 }
  0x4e   :  { %498 = vmatprep.subr.bf16.mxu0 %v754_v0  ;;  %518 = vmatprep.subr.bf16.mxu1 %v754_v0  ;;  %v599_v12 = vld [vmem:[#allocation8 + $0x28] sm:$0xff]   ;;  %v600_v13 = vld [vmem:[#allocation7 + $0x30] sm:$0xff]   ;;  %v602_v15 = vld [vmem:[#allocation7 + $0x38] sm:$0xff]   ;;  %p695_p4 = scmp.ne.s32.totalorder %s413_s30, %s694_s6  ;;  %p700_p6 = scmp.lt.s32.totalorder %s694_s6, %s694_s6 }
  0x4f   :  { %v601_v14 = vld [vmem:[#allocation8 + $0x30] sm:$0xff]   ;;  %v603_v16 = vld [vmem:[#allocation8 + $0x38] sm:$0xff]  }
  0x50   :  { %v604_v17 = vld [vmem:[#allocation2] sm:$0xff]   ;;  %v605_v18 = vld [vmem:[#allocation5] sm:$0xff]   ;;  %p701_p7 = por %p700_p6, %p699_p5 }
  0x51   :  { %499 = vmatpush3.bf16.msra.mxu0 %v590_v3  ;;  %519 = vmatpush3.bf16.msra.mxu1 %v591_v4 }
  0x52   :  { %500 = vmatprep.subr.bf16.mxu0 %v754_v0  ;;  %520 = vmatprep.subr.bf16.mxu1 %v754_v0  ;;  %p702_p8 = pnand %p701_p7, %p695_p4 }
  0x55   :  { %501 = vmatpush3.bf16.msra.mxu0 %v592_v5  ;;  %521 = vmatpush3.bf16.msra.mxu1 %v593_v6 }
  0x56   :  { %502 = vmatprep.subr.bf16.mxu0 %v754_v0  ;;  %522 = vmatprep.subr.bf16.mxu1 %v754_v0 }
  0x59   :  { %503 = vmatpush3.bf16.msra.mxu0 %v594_v7  ;;  %523 = vmatpush3.bf16.msra.mxu1 %v595_v8 }
  0x5a   :  { %504 = vmatprep.subr.bf16.mxu0 %v754_v0  ;;  %524 = vmatprep.subr.bf16.mxu1 %v754_v0 }
  0x5d   :  { %505 = vmatpush3.bf16.msra.mxu0 %v596_v9  ;;  %525 = vmatpush3.bf16.msra.mxu1 %v597_v10 }
  0x5e   :  { %506 = vmatprep.subr.bf16.mxu0 %v754_v0  ;;  %526 = vmatprep.subr.bf16.mxu1 %v754_v0 }
  0x61   :  { %507 = vmatpush3.bf16.msra.mxu0 %v598_v11  ;;  %527 = vmatpush3.bf16.msra.mxu1 %v599_v12 }
  0x62   :  { %508 = vmatprep.subr.bf16.mxu0 %v754_v0  ;;  %528 = vmatprep.subr.bf16.mxu1 %v754_v0 }
  0x65   :  { %509 = vmatpush3.bf16.msra.mxu0 %v600_v13  ;;  %529 = vmatpush3.bf16.msra.mxu1 %v601_v14 }
  0x66   :  { %510 = vmatprep.subr.bf16.mxu0 %v754_v0  ;;  %530 = vmatprep.subr.bf16.mxu1 %v754_v0 }
  0x69   :  { %511 = vmatpush3.bf16.msra.mxu0 %v602_v15  ;;  %531 = vmatpush3.bf16.msra.mxu1 %v603_v16 }
  0x6a   :  { %536 = vmatprep.subr.bf16.mxu0 %v754_v0  ;;  %556 = vmatprep.subr.bf16.mxu1 %v754_v0 }
  0x6c   :  { %513 = vmatmul.mubr.bf16.vlgmr.msra.gmra.mrb[0].mxu0 %v604_v17  ;;  %533 = vmatmul.mubr.bf16.vlgmr.msra.gmra.mrb[0].mxu1 %v605_v18 }
  0x6d   :  { %537 = vmatpush3.bf16.msra.mxu0 %v589_v2  ;;  %557 = vmatpush3.bf16.msra.mxu1 %v588_v1 }
  0x6e   :  { %538 = vmatprep.subr.bf16.mxu0 %v754_v0  ;;  %558 = vmatprep.subr.bf16.mxu1 %v754_v0 }
  0x6f   :  { %552 = vmatprep.mubr.msk.bf16.mxu0 %vm755_vm0, %v754_v0  ;;  %572 = vmatprep.mubr.msk.bf16.mxu1 %vm755_vm0, %v754_v0 }
  0x71   :  { %539 = vmatpush3.bf16.msra.mxu0 %v591_v4  ;;  %559 = vmatpush3.bf16.msra.mxu1 %v590_v3 }
  0x72   :  { %540 = vmatprep.subr.bf16.mxu0 %v754_v0  ;;  %560 = vmatprep.subr.bf16.mxu1 %v754_v0 }
  0x75   :  { %541 = vmatpush3.bf16.msra.mxu0 %v593_v6  ;;  %561 = vmatpush3.bf16.msra.mxu1 %v592_v5 }
  0x76   :  { %542 = vmatprep.subr.bf16.mxu0 %v754_v0  ;;  %562 = vmatprep.subr.bf16.mxu1 %v754_v0 }
  0x79   :  { %543 = vmatpush3.bf16.msra.mxu0 %v595_v8  ;;  %563 = vmatpush3.bf16.msra.mxu1 %v594_v7 }
  0x7a   :  { %544 = vmatprep.subr.bf16.mxu0 %v754_v0  ;;  %564 = vmatprep.subr.bf16.mxu1 %v754_v0 }
  0x7d   :  { %545 = vmatpush3.bf16.msra.mxu0 %v597_v10  ;;  %565 = vmatpush3.bf16.msra.mxu1 %v596_v9 }
  0x7e   :  { %546 = vmatprep.subr.bf16.mxu0 %v754_v0  ;;  %566 = vmatprep.subr.bf16.mxu1 %v754_v0 }
  0x81   :  { %547 = vmatpush3.bf16.msra.mxu0 %v599_v12  ;;  %567 = vmatpush3.bf16.msra.mxu1 %v598_v11 }
  0x82   :  { %548 = vmatprep.subr.bf16.mxu0 %v754_v0  ;;  %568 = vmatprep.subr.bf16.mxu1 %v754_v0 }
  0x85   :  { %549 = vmatpush3.bf16.msra.mxu0 %v601_v14  ;;  %569 = vmatpush3.bf16.msra.mxu1 %v600_v13 }
  0x86   :  { %550 = vmatprep.subr.bf16.mxu0 %v754_v0  ;;  %570 = vmatprep.subr.bf16.mxu1 %v754_v0 }
  0x89   :  { %551 = vmatpush3.bf16.msra.mxu0 %v603_v16  ;;  %571 = vmatpush3.bf16.msra.mxu1 %v602_v15 }
  0x8c   :  { %553 = vmatmul.mubr.bf16.vlgmr.msra.gmra.mrb[4].mxu0 %v604_v17  ;;  %573 = vmatmul.mubr.bf16.vlgmr.msra.gmra.mrb[4].mxu1 %v605_v18 }
 0x13f   :  { %v211_v19 = vpop.f32.mrb[0].mxu0  ;;  %v306_v20 = vpop.f32.mrb[0].mxu1 }
 0x140   :  { %v514_v21 = vpop.f32.mrb[1].mxu0  ;;  %v313_v22 = vsub.f32 %v211_v19, %v306_v20  ;;  %v534_v23 = vpop.f32.mrb[1].mxu1 }
 0x141   :  { %v214_v24 = vpop.f32.mrb[2].mxu0  ;;  %v309_v25 = vpop.f32.mrb[2].mxu1 }
 0x142   :  { %v515_v26 = vpop.f32.mrb[3].mxu0  ;;  %v314_v27 = vsub.f32 %v214_v24, %v309_v25  ;;  %v535_v28 = vpop.f32.mrb[3].mxu1  ;;  %317 = vst [vmem:[#allocation10] sm:$0xff] %v313_v22 }
 0x144   :  { %318 = vst [vmem:[#allocation10 + $0x8] sm:$0xff] %v314_v27 }
 0x145   :  { %705 = shalt.err (!%p702_p8)
}
 0x146   :  { %s706_s18 = scalar_lea.hbm %s938_s4, 256 }
 0x147   :  { %p707_p9 = scmp.ne.s32.totalorder %s938_s4, %s706_s18  ;;  %p710_p10 = scmp.lt.u32.totalorder %s706_s18, %s938_s4 }
 0x149   :  { %p712_p11 = pnand %p710_p10, %p707_p9 }
 0x14b   :  { %715 = shalt.err (!%p712_p11)
}
 0x14c   :  { %s757_s24 = smov 128   ;;  %s758_s25 = smov 8  }
 0x14d   :  { %418 = dma.vmem_to_hbm [thread:$0]  %s413_s30, 256, %s938_s4, [#allocation4], %s757_s24, %s757_s24, %s758_s25  }
 0x14e   :  { %s759_s28 = smov [#allocation11]  }
 0x14f   :  { %s424_s29 = sshll.u32 %s759_s28, 4  ;;  %s425_s29 = int_to_ptr.vmem [resolvable:$true] %s424_s29 }
 0x150   :  { %s716_s0 = scalar_lea.vmem %s425_s29, 256  ;;  %p721_p13 = scmp.lt.s32.totalorder %s425_s29, %s425_s29 }
 0x151   :  { %p717_p12 = scmp.ne.s32.totalorder %s425_s29, %s716_s0  ;;  %p722_p0 = scmp.lt.s32.totalorder %s716_s0, %s716_s0 }
 0x153   :  { %p723_p1 = por %p722_p0, %p721_p13 }
 0x155   :  { %p724_p2 = pnand %p723_p1, %p717_p12 }
 0x15f   :  { %v355_v29 = vpop.f32.mrb[4].mxu0  ;;  %v396_v30 = vpop.f32.mrb[4].mxu1 }
 0x160   :  { %v554_v31 = vpop.f32.mrb[5].mxu0  ;;  %v397_v32 = vadd.f32 %v396_v30, %v355_v29  ;;  %v574_v33 = vpop.f32.mrb[5].mxu1 }
 0x161   :  { %v358_v34 = vpop.f32.mrb[6].mxu0  ;;  %v399_v35 = vpop.f32.mrb[6].mxu1 }
 0x162   :  { %v555_v36 = vpop.f32.mrb[7].mxu0  ;;  %v400_v37 = vadd.f32 %v399_v35, %v358_v34  ;;  %v575_v38 = vpop.f32.mrb[7].mxu1  ;;  %405 = vst [vmem:[#allocation11] sm:$0xff] %v397_v32 }
 0x164   :  { %406 = vst [vmem:[#allocation11 + $0x8] sm:$0xff] %v400_v37 }
 0x165   :  { %727 = shalt.err (!%p724_p2)
}
 0x166   :  { %s728_s7 = scalar_lea.hbm %s939_s5, 256 }
 0x167   :  { %p729_p3 = scmp.ne.s32.totalorder %s939_s5, %s728_s7  ;;  %p732_p4 = scmp.lt.u32.totalorder %s728_s7, %s939_s5 }
 0x169   :  { %p734_p5 = pnand %p732_p4, %p729_p3 }
 0x16b   :  { %737 = shalt.err (!%p734_p5)
}
 0x16c   :  { %430 = dma.vmem_to_hbm [thread:$0]  %s425_s29, 256, %s939_s5, [#allocation12], %s757_s24, %s757_s24, %s758_s25  }
 0x16d   :  { %744 = dma.done.wait [#allocation4], 256  }
 0x16e   :  { %745 = vsyncadd [#allocation4], 4294967040 }
 0x16f   :  { %746 = dma.done.wait [#allocation12], 256  }
 0x170   :  { %747 = vsyncadd [#allocation12], 4294967040 }
 0x171   :  { %437 = vsyncpa [#allocation3], 1 }
 0x172   :  { %438 = vsyncpa [#allocation6], 1 }
 0x173   :  { %439 = vsyncpa [#allocation9], 1 }
 0x174   :  { %440 = vsyncpa [#allocation4], 1 }
 0x175   :  { %441 = vsyncpa [#allocation12], 1 }

</bundles_post_ra>
